<compile_context>
chip_gen: v6e
topology: v6e:2x2x1
jax: 0.10.0
libtpu: 0.0.40
codegen_flags: <defaults>
</compile_context>

<pallas_src>
import jax
import jax.numpy as jnp
from jax.experimental import pallas as pl
from jax.experimental.pallas import tpu as pltpu


def _round_up(x, m):
    return (x + m - 1) // m * m


def _energy_mlp_kernel(x_ref, w1_ref, b1_ref, w2r_ref, b2_ref, o_ref):
    # x:   (TB, H)   — one batch tile, streamed / pipelined
    # w1:  (H, H2)   — resident in VMEM (constant index_map)
    # b1:  (1, H2)   — resident
    # w2r: (1, H2)   — resident (second-layer weights as a row)
    # b2:  (1,) SMEM — scalar bias
    # o:   (1, TB)   — lane-dense output row (batch on the lane axis)
    h = jnp.dot(x_ref[...], w1_ref[...], preferred_element_type=jnp.float32)
    h = jnp.maximum(h + b1_ref[...], 0.0)                         # (TB, H2) f32
    # Contract the H2 axis of w2_row against the H2 axis of h -> (1, TB),
    # i.e. A @ B^T (same structure as q @ k^T in attention). Output lands
    # with batch on lanes, so the store below is a dense, unmasked vst.
    e = jax.lax.dot_general(
        w2r_ref[...].astype(jnp.float32), h,
        dimension_numbers=(((1,), (1,)), ((), ())),
        preferred_element_type=jnp.float32)                       # (1, TB)
    o_ref[...] = (e + b2_ref[0]).astype(o_ref.dtype)


def energy_func_pallas(comp, w1, b1, w2, b2, *, tb=1024):
    """Pallas energy function: per-row scalar energy of `comp` -> (B, 1) f32."""
    B, H = comp.shape
    H2 = w1.shape[1]

    # Batch tile: multiple of 128 so the output row is lane-dense, no larger
    # than needed. For very large B / wide H, re-derive TB against the VMEM
    # budget of the target generation (64 MiB on v7x vs 128 MiB on v5e/v6e)
    # and raise vmem_limit_bytes via pltpu.CompilerParams if the scoped
    # default becomes the limiter.
    TB = min(tb, _round_up(B, 128))
    B_pad = _round_up(B, TB)
    num_tiles = B_pad // TB

    if B_pad != B:
        comp = jnp.pad(comp, ((0, B_pad - B), (0, 0)))

    w2_row = jnp.reshape(w2, (1, H2))                 # (H2, 1) -> (1, H2)
    b1_row = jnp.reshape(b1, (1, H2))
    b2_s = jnp.reshape(b2, (1,)).astype(jnp.float32)  # scalar -> SMEM

    itemsize = jnp.dtype(comp.dtype).itemsize
    cost = pl.CostEstimate(
        flops=2 * B_pad * H * H2 + 2 * B_pad * H2,
        transcendentals=0,
        bytes_accessed=B_pad * H * itemsize            # streaming x tiles
        + (H * H2 + 2 * H2 + 1) * 4                    # resident weights/biases
        + B_pad * 4,                                   # output row
    )

    out = pl.pallas_call(
        _energy_mlp_kernel,
        out_shape=jax.ShapeDtypeStruct((1, B_pad), jnp.float32),
        grid=(num_tiles,),
        in_specs=[
            pl.BlockSpec((TB, H), lambda i: (i, 0)),            # x: streamed
            pl.BlockSpec((H, H2), lambda i: (0, 0)),            # w1: resident
            pl.BlockSpec((1, H2), lambda i: (0, 0)),            # b1: resident
            pl.BlockSpec((1, H2), lambda i: (0, 0)),            # w2 row: resident
            pl.BlockSpec(memory_space=pltpu.MemorySpace.SMEM),  # b2 scalar
        ],
        out_specs=pl.BlockSpec((1, TB), lambda i: (0, i)),
        compiler_params=pltpu.CompilerParams(
            dimension_semantics=("parallel",),   # independent batch tiles
        ),
        cost_estimate=cost,
    )(comp, w1, b1_row, w2_row, b2_s)

    # (1, B_pad) lane-dense slab -> (B, 1) as the module's interface expects.
    return out.reshape(B_pad, 1)[:B]


class ComplexOnlyStrategy:
    """Strategy that only returns the prediction for the complex.

    forward(comp, *parts) -> energy_func(comp); `parts` are ignored,
    exactly matching the PyTorch module semantics.
    """

    def __init__(self, energy_func):
        self.energy_func = energy_func

    def __call__(self, comp, *parts):
        return self.forward(comp, *parts)

    def forward(self, comp, *parts):
        complex_pred = self.energy_func(comp)
        return complex_pred


def _init_params(key, hidden, hidden2):
    k1, k2, k3, k4 = jax.random.split(key, 4)
    # Deterministic small-scale init (synthetic weights, not a checkpoint).
    w1 = jax.random.normal(k1, (hidden, hidden2), jnp.float32) * 0.1
    b1 = jax.random.normal(k2, (1, hidden2), jnp.float32) * 0.01
    w2 = jax.random.normal(k3, (hidden2, 1), jnp.float32) * 0.1
    b2 = jax.random.normal(k4, (1, 1), jnp.float32) * 0.01
    return w1, b1, w2, b2


if __name__ == "__main__":
    key = jax.random.PRNGKey(0)
    B, H, H2 = 8, 32, 64  # small shapes: batch=8, hidden=32 -> 64 -> 1

    kx, kp1, kp2, kw = jax.random.split(key, 4)
    comp = jax.random.normal(kx, (B, H), jnp.float32)           # the complex rep
    part_ligand = jax.random.normal(kp1, (B, H), jnp.float32)   # ignored part
    part_protein = jax.random.normal(kp2, (B, H), jnp.float32)  # ignored part

    w1, b1, w2, b2 = _init_params(kw, H, H2)

    energy_func = lambda x: energy_func_pallas(x, w1, b1, w2, b2)
    strategy = ComplexOnlyStrategy(energy_func)

    pred = strategy(comp, part_ligand, part_protein)
    pred = jax.block_until_ready(pred)

    # Pure-JAX reference to check semantics.
    ref = jnp.maximum(comp @ w1 + b1, 0.0) @ w2 + b2
    assert pred.shape == (B, 1)
    assert jnp.allclose(pred, ref, atol=1e-5, rtol=1e-5)

    print("KERNEL_OK")
</pallas_src>

<mosaic_0001>
module attributes {stable_mosaic.version = 11 : i64} {
  func.func @_energy_mlp_kernel(%arg0: i32, %arg1: memref<128x32xf32, #tpu.memory_space<vmem>>, %arg2: memref<32x64xf32, #tpu.memory_space<vmem>>, %arg3: memref<1x64xf32, #tpu.memory_space<vmem>>, %arg4: memref<1x64xf32, #tpu.memory_space<vmem>>, %arg5: memref<1xf32, #tpu.memory_space<smem>>, %arg6: memref<1x128xf32, #tpu.memory_space<vmem>>) attributes {dimension_semantics = [#tpu.dimension_semantics<parallel>], iteration_bounds = array<i64: 1>, scalar_prefetch = 0 : i64, scratch_operands = 0 : i64, tpu.core_type = #tpu.core_type<tc>, window_params = [{transform_indices = @transform_0, window_bounds = array<i64: 128, 32>}, {pipeline_mode = #tpu.pipeline_mode<synchronous>, transform_indices = @transform_1, window_bounds = array<i64: 32, 64>}, {pipeline_mode = #tpu.pipeline_mode<synchronous>, transform_indices = @transform_2, window_bounds = array<i64: 1, 64>}, {pipeline_mode = #tpu.pipeline_mode<synchronous>, transform_indices = @transform_3, window_bounds = array<i64: 1, 64>}, {transform_indices = @transform_4, window_bounds = array<i64: 1>}, {transform_indices = @transform_5, window_bounds = array<i64: 1, 128>}]} {
    %c0 = arith.constant 0 : index
    %c0_0 = arith.constant 0 : index
    %0 = vector.load %arg1[%c0, %c0_0] : memref<128x32xf32, #tpu.memory_space<vmem>>, vector<128x32xf32>
    %c0_1 = arith.constant 0 : index
    %c0_2 = arith.constant 0 : index
    %1 = vector.load %arg2[%c0_1, %c0_2] : memref<32x64xf32, #tpu.memory_space<vmem>>, vector<32x64xf32>
    %cst = arith.constant dense<0.000000e+00> : vector<128x64xf32>
    %2 = tpu.matmul %0, %1, %cst {dimension_numbers = #tpu.dot_dimension_numbers<[1], [0], [0], [1], [0, 0, 1, 1], [], []>} : vector<128x32xf32>, vector<32x64xf32>, vector<128x64xf32> -> vector<128x64xf32>
    %c0_3 = arith.constant 0 : index
    %c0_4 = arith.constant 0 : index
    %3 = vector.load %arg3[%c0_3, %c0_4] : memref<1x64xf32, #tpu.memory_space<vmem>>, vector<1x64xf32>
    %4 = vector.broadcast %3 : vector<1x64xf32> to vector<128x64xf32>
    %5 = arith.addf %2, %4 : vector<128x64xf32>
    %cst_5 = arith.constant 0.000000e+00 : f32
    %6 = vector.broadcast %cst_5 : f32 to vector<128x64xf32>
    %7 = arith.maximumf %5, %6 : vector<128x64xf32>
    %c0_6 = arith.constant 0 : index
    %c0_7 = arith.constant 0 : index
    %8 = vector.load %arg4[%c0_6, %c0_7] : memref<1x64xf32, #tpu.memory_space<vmem>>, vector<1x64xf32>
    %cst_8 = arith.constant dense<0.000000e+00> : vector<1x128xf32>
    %9 = tpu.matmul %8, %7, %cst_8 {dimension_numbers = #tpu.dot_dimension_numbers<[1], [1], [0], [0], [0, 0, 1, 0], [], []>} : vector<1x64xf32>, vector<128x64xf32>, vector<1x128xf32> -> vector<1x128xf32>
    %c0_9 = arith.constant 0 : index
    %10 = memref.load %arg5[%c0_9] : memref<1xf32, #tpu.memory_space<smem>>
    %11 = vector.broadcast %10 : f32 to vector<1x128xf32>
    %12 = arith.addf %9, %11 : vector<1x128xf32>
    %c0_10 = arith.constant 0 : index
    %c0_11 = arith.constant 0 : index
    %13 = vector.load %arg6[%c0_10, %c0_11] : memref<1x128xf32, #tpu.memory_space<vmem>>, vector<1x128xf32>
    tpu.vector_store %arg6[%c0_10, %c0_11], %12 {strides = array<i32>} : memref<1x128xf32, #tpu.memory_space<vmem>>, vector<1x128xf32>,
    return
  }
  func.func @transform_0(%arg0: i32) -> (i32, i32) {
    %c0_i32 = arith.constant 0 : i32
    %c0_i32_0 = arith.constant 0 : i32
    return %arg0, %c0_i32 : i32, i32
  }
  func.func @transform_1(%arg0: i32) -> (i32, i32) {
    %c0_i32 = arith.constant 0 : i32
    %c0_i32_0 = arith.constant 0 : i32
    %c0_i32_1 = arith.constant 0 : i32
    return %c0_i32, %c0_i32_0 : i32, i32
  }
  func.func @transform_2(%arg0: i32) -> (i32, i32) {
    %c0_i32 = arith.constant 0 : i32
    %c0_i32_0 = arith.constant 0 : i32
    %c0_i32_1 = arith.constant 0 : i32
    return %c0_i32, %c0_i32_0 : i32, i32
  }
  func.func @transform_3(%arg0: i32) -> (i32, i32) {
    %c0_i32 = arith.constant 0 : i32
    %c0_i32_0 = arith.constant 0 : i32
    %c0_i32_1 = arith.constant 0 : i32
    return %c0_i32, %c0_i32_0 : i32, i32
  }
  func.func @transform_4(%arg0: i32) -> i32 {
    %c0_i32 = arith.constant 0 : i32
    %c0_i32_0 = arith.constant 0 : i32
    return %c0_i32 : i32
  }
  func.func @transform_5(%arg0: i32) -> (i32, i32) {
    %c0_i32 = arith.constant 0 : i32
    %c0_i32_0 = arith.constant 0 : i32
    return %c0_i32, %arg0 : i32, i32
  }
}

</mosaic_0001>

<bundles_post_ra>
// kernel: tpu_custom_call.1
= control target key start
LH: loop header
LB: loop body
LE: loop exit
PB: predicated region body
PF: predicated region fallthrough
CT: control target
= control target key end

     0   :  { %vm49_vm0 = vcmask 261120   ;;  %s726_s0 = inlined_call_operand.vmem [shape: f32[128,32], index: 0, kind: input, shape index: {}]   ;;  %s727_s1 = inlined_call_operand.vmem [shape: f32[32,64], index: 1, kind: input, shape index: {}]   ;;  %s728_s2 = inlined_call_operand.vmem [shape: f32[1,64], index: 2, kind: input, shape index: {}]   ;;  %s729_s3 = inlined_call_operand.vmem [shape: f32[1,64], index: 3, kind: input, shape index: {}]   ;;  %s730_s4 = inlined_call_operand.<no memory space> [shape: f32[1], index: 4, kind: input, shape index: {}]   ;;  %s731_s5 = inlined_call_operand.hbm [shape: f32[1,128], index: 5, kind: output, shape index: {}]  }
   0x1   :  { %v41_v0 = vld [vmem:[%s727_s1 + $0x18] sm:$0xff]  ;;  %v40_v1 = vld [vmem:[%s727_s1 + $0x10] sm:$0xff]  ;;  %v22_v2 = vld [vmem:[%s726_s0] sm:$0xff] }
   0x2   :  { %470 = vmatprep.subr.mxu0 %v41_v0  ;;  %v39_v3 = vld [vmem:[%s727_s1 + $0x8] sm:$0xff]  ;;  %478 = vmatprep.mubr.msk.f32.mxu0 %vm49_vm0, %v22_v2  ;;  %v38_v4 = vld [vmem:[%s727_s1] sm:$0xff] }
   0x3   :  { %471 = vmatpush3.msra.mxu0 %v41_v0  ;;  %v23_v5 = vld [vmem:[%s726_s0 + $0x8] sm:$0xff] }
   0x4   :  { %472 = vmatprep.subr.mxu0 %v40_v1 }
   0x5   :  { %473 = vmatpush3.msra.mxu0 %v40_v1 }
   0x6   :  { %474 = vmatprep.subr.mxu0 %v39_v3 }
   0x7   :  { %475 = vmatpush3.msra.mxu0 %v39_v3 }
   0x8   :  { %11 = vsyncpa [#allocation4], 0  ;;  %476 = vmatprep.subr.mxu0 %v38_v4  ;;  %v24_v6 = vld [vmem:[%s726_s0 + $0x10] sm:$0xff]  ;;  %v25_v7 = vld [vmem:[%s726_s0 + $0x18] sm:$0xff]  ;;  %v562_v20 = vmov 0.0   ;;  %vm563_vm1 = vmmov 0  }
   0x9   :  { %477 = vmatpush3.msra.mxu0 %v38_v4  ;;  %v26_v8 = vld [vmem:[%s726_s0 + $0x20] sm:$0xff]  ;;  %v27_v9 = vld [vmem:[%s726_s0 + $0x28] sm:$0xff]  ;;  %v28_v10 = vld [vmem:[%s726_s0 + $0x30] sm:$0xff]  ;;  %502 = vmatprep.subr.mxu1 %v562_v20  ;;  %vm262_vm2 = vcmask 523264   ;;  %s564_s10 = smov [#allocation3]  }
   0xa   :  { %479 = vmatmul.mubr.msk.f32.vlgmr.msra.gmra.mxu0 %vm49_vm0, %v23_v5  ;;  %v29_v11 = vld [vmem:[%s726_s0 + $0x38] sm:$0xff]  ;;  %v30_v12 = vld [vmem:[%s726_s0 + $0x40] sm:$0xff]  ;;  %v31_v13 = vld [vmem:[%s726_s0 + $0x48] sm:$0xff]  ;;  %534 = vmatprep.mubr.msk.f32.mxu1 %vm563_vm1, %v562_v20  ;;  %s391_s11 = sshll.u32 %s564_s10, 4  ;;  %s392_s11 = int_to_ptr.vmem [resolvable:$true] %s391_s11 }
   0xb   :  { %481 = vmatprep.mubr.msk.f32.mxu0 %vm49_vm0, %v24_v6  ;;  %v32_v14 = vld [vmem:[%s726_s0 + $0x50] sm:$0xff]  ;;  %v33_v15 = vld [vmem:[%s726_s0 + $0x58] sm:$0xff]  ;;  %v34_v16 = vld [vmem:[%s726_s0 + $0x60] sm:$0xff]  ;;  %s540_s12 = scalar_lea.vmem %s392_s11, 16  ;;  %s544_s13 = scalar_lea.vmem %s392_s11, 32 }
   0xc   :  { %v35_v17 = vld [vmem:[%s726_s0 + $0x68] sm:$0xff]  ;;  %v36_v18 = vld [vmem:[%s726_s0 + $0x70] sm:$0xff]  ;;  %v37_v19 = vld [vmem:[%s726_s0 + $0x78] sm:$0xff]  ;;  %p541_p0 = scmp.ne.s32.totalorder %s392_s11, %s540_s12  ;;  %p545_p1 = scmp.lt.s32.totalorder %s392_s11, %s392_s11 }
   0xd   :  { %v399_v35 = vld [vmem:[%s728_s2] ss:$0 sm:$0xff]  ;;  %p546_p2 = scmp.lt.s32.totalorder %s544_s13, %s540_s12 }
   0xe   :  { %482 = vmatmul.mubr.msk.f32.gmra.mxu0 %vm49_vm0, %v25_v7  ;;  %v259_v6 = vld [vmem:[%s729_s3] sm:$0x1]  ;;  %v261_v7 = vstv %s730_s4 }
   0xf   :  { %484 = vmatprep.mubr.msk.f32.mxu0 %vm49_vm0, %v26_v8  ;;  %p547_p3 = por %p546_p2, %p545_p1 }
  0x11   :  { %p548_p4 = pnand %p547_p3, %p541_p0 }
  0x12   :  { %485 = vmatmul.mubr.msk.f32.gmra.mxu0 %vm49_vm0, %v27_v9 }
  0x13   :  { %487 = vmatprep.mubr.msk.f32.mxu0 %vm49_vm0, %v28_v10 }
  0x16   :  { %488 = vmatmul.mubr.msk.f32.gmra.mxu0 %vm49_vm0, %v29_v11 }
  0x17   :  { %490 = vmatprep.mubr.msk.f32.mxu0 %vm49_vm0, %v30_v12 }
  0x1a   :  { %491 = vmatmul.mubr.msk.f32.gmra.mxu0 %vm49_vm0, %v31_v13 }
  0x1b   :  { %493 = vmatprep.mubr.msk.f32.mxu0 %vm49_vm0, %v32_v14 }
  0x1e   :  { %494 = vmatmul.mubr.msk.f32.gmra.mxu0 %vm49_vm0, %v33_v15 }
  0x1f   :  { %496 = vmatprep.mubr.msk.f32.mxu0 %vm49_vm0, %v34_v16 }
  0x22   :  { %497 = vmatmul.mubr.msk.f32.gmra.mxu0 %vm49_vm0, %v35_v17 }
  0x23   :  { %499 = vmatprep.mubr.msk.f32.mxu0 %vm49_vm0, %v36_v18 }
  0x26   :  { %500 = vmatmul.mubr.msk.f32.gmra.mxu0 %vm49_vm0, %v37_v19 }
  0xca   :  { %v673_v21 = vpop.f32.mrf.mxu0 }
  0xcb   :  { %v170_v1 = vadd.f32 %v673_v21, %v399_v35 }
  0xcc   :  { %v675_v22 = vpop.f32.mrf.mxu0 }
  0xcd   :  { %v244_v3 = vmax.f32 %v170_v1, 0.0  ;;  %v165_v4 = vadd.f32 %v399_v35, %v675_v22 }
  0xce   :  { %v483_v23 = vpop.f32.mrf.mxu0 }
  0xcf   :  { %v180_v61 = vadd.f32 %v483_v23, %v399_v35  ;;  %v243_v5 = vmax.f32 %v165_v4, 0.0 }
  0xd0   :  { %v677_v24 = vpop.f32.mrf.mxu0 }
  0xd1   :  { %v246_v63 = vmax.f32 %v180_v61, 0.0  ;;  %v175_v0 = vadd.f32 %v399_v35, %v677_v24 }
  0xd2   :  { %v486_v25 = vpop.f32.mrf.mxu0 }
  0xd3   :  { %v190_v57 = vadd.f32 %v486_v25, %v399_v35  ;;  %v245_v2 = vmax.f32 %v175_v0, 0.0 }
  0xd4   :  { %v184_v26 = vpop.f32.mrf.mxu0 }
  0xd5   :  { %v248_v59 = vmax.f32 %v190_v57, 0.0  ;;  %v185_v60 = vadd.f32 %v399_v35, %v184_v26 }
  0xd6   :  { %v489_v27 = vpop.f32.mrf.mxu0 }
  0xd7   :  { %v200_v53 = vadd.f32 %v489_v27, %v399_v35  ;;  %v247_v62 = vmax.f32 %v185_v60, 0.0 }
  0xd8   :  { %v194_v28 = vpop.f32.mrf.mxu0 }
  0xd9   :  { %v250_v55 = vmax.f32 %v200_v53, 0.0  ;;  %v195_v56 = vadd.f32 %v399_v35, %v194_v28 }
  0xda   :  { %v492_v29 = vpop.f32.mrf.mxu0 }
  0xdb   :  { %v210_v49 = vadd.f32 %v492_v29, %v399_v35  ;;  %v249_v58 = vmax.f32 %v195_v56, 0.0 }
  0xdc   :  { %v204_v30 = vpop.f32.mrf.mxu0 }
  0xdd   :  { %v252_v51 = vmax.f32 %v210_v49, 0.0  ;;  %v205_v52 = vadd.f32 %v399_v35, %v204_v30 }
  0xde   :  { %v495_v31 = vpop.f32.mrf.mxu0 }
  0xdf   :  { %v220_v45 = vadd.f32 %v495_v31, %v399_v35  ;;  %v251_v54 = vmax.f32 %v205_v52, 0.0 }
  0xe0   :  { %v214_v32 = vpop.f32.mrf.mxu0 }
  0xe1   :  { %v254_v47 = vmax.f32 %v220_v45, 0.0  ;;  %v215_v48 = vadd.f32 %v399_v35, %v214_v32 }
  0xe2   :  { %v498_v33 = vpop.f32.mrf.mxu0 }
  0xe3   :  { %v230_v41 = vadd.f32 %v498_v33, %v399_v35  ;;  %v253_v50 = vmax.f32 %v215_v48, 0.0 }
  0xe4   :  { %v224_v34 = vpop.f32.mrf.mxu0 }
  0xe5   :  { %v256_v43 = vmax.f32 %v230_v41, 0.0  ;;  %v225_v44 = vadd.f32 %v399_v35, %v224_v34 }
  0xe6   :  { %v501_v36 = vpop.f32.mrf.mxu0 }
  0xe7   :  { %v240_v37 = vadd.f32 %v501_v36, %v399_v35  ;;  %v255_v46 = vmax.f32 %v225_v44, 0.0 }
  0xe8   :  { %v234_v38 = vpop.f32.mrf.mxu0 }
  0xe9   :  { %v258_v39 = vmax.f32 %v240_v37, 0.0  ;;  %v235_v40 = vadd.f32 %v399_v35, %v234_v38 }
  0xeb   :  { %503 = vmatpush3.xpose.msk.msra.mxu1 %vm262_vm2, %v258_v39  ;;  %v257_v42 = vmax.f32 %v235_v40, 0.0 }
  0xec   :  { %504 = vmatprep.subr.mxu1 %v562_v20 }
  0xef   :  { %505 = vmatpush3.xpose.msk.msra.mxu1 %vm262_vm2, %v257_v42 }
  0xf0   :  { %506 = vmatprep.subr.mxu1 %v562_v20 }
  0xf3   :  { %507 = vmatpush3.xpose.msk.msra.mxu1 %vm262_vm2, %v256_v43 }
  0xf4   :  { %508 = vmatprep.subr.mxu1 %v562_v20 }
  0xf7   :  { %509 = vmatpush3.xpose.msk.msra.mxu1 %vm262_vm2, %v255_v46 }
  0xf8   :  { %510 = vmatprep.subr.mxu1 %v562_v20 }
  0xfb   :  { %511 = vmatpush3.xpose.msk.msra.mxu1 %vm262_vm2, %v254_v47 }
  0xfc   :  { %512 = vmatprep.subr.mxu1 %v562_v20 }
  0xff   :  { %513 = vmatpush3.xpose.msk.msra.mxu1 %vm262_vm2, %v253_v50 }
 0x100   :  { %514 = vmatprep.subr.mxu1 %v562_v20 }
 0x103   :  { %515 = vmatpush3.xpose.msk.msra.mxu1 %vm262_vm2, %v252_v51 }
 0x104   :  { %516 = vmatprep.subr.mxu1 %v562_v20 }
 0x107   :  { %517 = vmatpush3.xpose.msk.msra.mxu1 %vm262_vm2, %v251_v54 }
 0x108   :  { %518 = vmatprep.subr.mxu1 %v562_v20 }
 0x10b   :  { %519 = vmatpush3.xpose.msk.msra.mxu1 %vm262_vm2, %v250_v55 }
 0x10c   :  { %520 = vmatprep.subr.mxu1 %v562_v20 }
 0x10f   :  { %521 = vmatpush3.xpose.msk.msra.mxu1 %vm262_vm2, %v249_v58 }
 0x110   :  { %522 = vmatprep.subr.mxu1 %v562_v20 }
 0x113   :  { %523 = vmatpush3.xpose.msk.msra.mxu1 %vm262_vm2, %v248_v59 }
 0x114   :  { %524 = vmatprep.subr.mxu1 %v562_v20 }
 0x117   :  { %525 = vmatpush3.xpose.msk.msra.mxu1 %vm262_vm2, %v247_v62 }
 0x118   :  { %526 = vmatprep.subr.mxu1 %v562_v20 }
 0x11b   :  { %527 = vmatpush3.xpose.msk.msra.mxu1 %vm262_vm2, %v246_v63 }
 0x11c   :  { %528 = vmatprep.subr.mxu1 %v562_v20 }
 0x11f   :  { %529 = vmatpush3.xpose.msk.msra.mxu1 %vm262_vm2, %v245_v2 }
 0x120   :  { %530 = vmatprep.subr.mxu1 %v562_v20 }
 0x123   :  { %531 = vmatpush3.xpose.msk.msra.mxu1 %vm262_vm2, %v244_v3 }
 0x124   :  { %532 = vmatprep.subr.mxu1 %v562_v20 }
 0x127   :  { %533 = vmatpush3.xpose.msk.msra.mxu1 %vm262_vm2, %v243_v5 }
 0x12a   :  { %535 = vmatmul.mubr.msk.f32.vlgmr.msra.gmra.mxu1 %vm262_vm2, %v259_v6 }
 0x1ea   :  { %v380_v8 = vpop.f32.mrf.mxu1 }
 0x1eb   :  { %v381_v9 = vadd.f32 %v380_v8, %v261_v7 }
 0x1ec   :  { %v536_v10 = vpop.f32.mrf.mxu1 }
 0x1ed   :  { %384 = vst [vmem:[#allocation3] sm:$0x1] %v381_v9 }
 0x1ee   :  { %551 = shalt.err (!%p548_p4)
}
 0x1ef   :  { %394 = dma.vmem_to_hbm [thread:$0]  %s392_s11, 16, %s731_s5, [#allocation4]  }
 0x1f0   :  { %560 = dma.done.wait [#allocation4], 16  }
 0x1f1   :  { %561 = vsyncadd [#allocation4], 4294967280 }
 0x1f2   :  { %398 = vsyncpa [#allocation4], 1 }

</bundles_post_ra>
